<compile_context>
chip_gen: v6e
topology: v6e:2x2x1
jax: 0.10.0
libtpu: 0.0.40
codegen_flags: <defaults>
</compile_context>

<pallas_src>
import jax
import jax.numpy as jnp
from jax.experimental import pallas as pl
from jax.experimental.pallas import tpu as pltpu

_LANE = 128
_MAX_BATCH_TILE = 16  # cap static unroll length inside the kernel


def _graphconv_kernel(x2d_ref, a_ref, w_ref, b_ref, o_ref):
    # x2d_ref: (bt*N, F)  a_ref: (bt, N, N)  w_ref: (F, Cp)
    # b_ref:   (N, Cp) f32                   o_ref: (bt, N, Cp)
    bt, N, _ = a_ref.shape

    # Hoisted X @ W for the whole batch tile: one tall, lane-dense MXU matmul.
    xw = jnp.dot(x2d_ref[...], w_ref[...],
                 preferred_element_type=jnp.float32)          # (bt*N, Cp) f32

    bias = b_ref[...]                                         # (N, Cp) f32
    mxu_dtype = a_ref.dtype

    # Batched A @ XW as a short static unroll of 2-D MXU dots.
    # Slicing xw (f32, sublane tile 8) at multiples of N=8 is alignment-clean.
    for b in range(bt):
        xw_b = xw[b * N:(b + 1) * N, :].astype(mxu_dtype)     # (N, Cp)
        axw = jnp.dot(a_ref[b], xw_b,
                      preferred_element_type=jnp.float32)     # (N, Cp) f32
        o_ref[b] = (axw + bias).astype(o_ref.dtype)


def _pick_batch_tile(B, N, F, Cp, in_itemsize, out_itemsize,
                     vmem_budget_bytes=24 * 1024 * 1024):
    """Largest divisor of B (<= cap) whose double-buffered footprint fits VMEM."""
    cap = min(B, _MAX_BATCH_TILE)
    for bt in range(cap, 0, -1):
        if B % bt:
            continue
        x_b = bt * N * F * in_itemsize
        a_b = bt * N * N * in_itemsize
        o_b = bt * N * Cp * out_itemsize
        resident = F * Cp * in_itemsize + N * Cp * 4
        if 2 * (x_b + a_b + o_b) + 2 * resident <= vmem_budget_bytes:
            return bt
    return 1


def graph_conv(X, A, W, bias, *, use_bf16_mxu=True):
    """X: (B, N, F), A: (B, N, N), W: (F, C), bias: (N, C) -> (B, N, C)."""
    B, N, F = X.shape
    C = W.shape[1]
    out_dtype = X.dtype

    # Pad channel dim to a multiple of 128 lanes: lane-dense stores, full MXU width.
    Cp = pl.cdiv(C, _LANE) * _LANE
    W_p = jnp.pad(W, ((0, 0), (0, Cp - C)))
    b_p = jnp.pad(bias, ((0, 0), (0, Cp - C))).astype(jnp.float32)

    # bf16 operands for the MXU (f32 accumulation inside the kernel).
    if use_bf16_mxu:
        Xm, Am, Wm = (t.astype(jnp.bfloat16) for t in (X, A, W_p))
    else:
        Xm, Am, Wm = X, A, W_p

    # X flattened to 2-D in the wrapper (free XLA reshape) so the kernel's X @ W is
    # one tall matmul across the whole batch tile.
    X2d = Xm.reshape(B * N, F)

    in_itemsize = jnp.dtype(Xm.dtype).itemsize
    bt = _pick_batch_tile(B, N, F, Cp, in_itemsize, jnp.dtype(out_dtype).itemsize)
    grid = (B // bt,)

    out_padded = pl.pallas_call(
        _graphconv_kernel,
        out_shape=jax.ShapeDtypeStruct((B, N, Cp), out_dtype),
        grid_spec=pltpu.PrefetchScalarGridSpec(
            num_scalar_prefetch=0,
            grid=grid,
            in_specs=[
                pl.BlockSpec((bt * N, F), lambda i: (i, 0)),        # X (2-D)
                pl.BlockSpec((bt, N, N), lambda i: (i, 0, 0)),      # A
                pl.BlockSpec((F, Cp), lambda i: (0, 0)),            # W (resident)
                pl.BlockSpec((N, Cp), lambda i: (0, 0)),            # bias (resident)
            ],
            out_specs=pl.BlockSpec((bt, N, Cp), lambda i: (i, 0, 0)),
        ),
        compiler_params=pltpu.CompilerParams(
            dimension_semantics=("parallel",),
        ),
    )(X2d, Am, Wm, b_p)

    return out_padded[:, :, :C]


def reference_f32(X, A, W, bias):
    return jnp.einsum("bnm,bmf,fc->bnc", A, X, W) + bias[None]


def reference_bf16_mxu(X, A, W, bias):
    # Mirrors the kernel's bf16-operand / f32-accumulate path.
    Xb = X.astype(jnp.bfloat16).astype(jnp.float32)
    Ab = A.astype(jnp.bfloat16).astype(jnp.float32)
    Wb = W.astype(jnp.bfloat16).astype(jnp.float32)
    xw = jnp.einsum("bnf,fc->bnc", Xb, Wb).astype(jnp.bfloat16).astype(jnp.float32)
    return jnp.einsum("bnm,bmc->bnc", Ab, xw) + bias[None]


if __name__ == "__main__":
    B, N, F, C = 2, 8, 16, 32   # batch=2, N=8 nodes, F=16 input feats, channels=32

    key = jax.random.PRNGKey(0)
    kx, ka, kw = jax.random.split(key, 3)

    X = jax.random.normal(kx, (B, N, F), dtype=jnp.float32)
    A = jax.random.normal(ka, (B, N, N), dtype=jnp.float32)

    # Xavier-uniform kernel (F, C); bias = ones(N, C), as in the PyTorch module.
    bound = (6.0 / (F + C)) ** 0.5
    W = jax.random.uniform(kw, (F, C), minval=-bound, maxval=bound, dtype=jnp.float32)
    bias = jnp.ones((N, C), dtype=jnp.float32)

    # Optimized path: bf16 MXU operands, f32 accumulation.
    out = graph_conv(X, A, W, bias, use_bf16_mxu=True)
    jax.block_until_ready(out)
    assert out.shape == (B, N, C)
    assert out.dtype == X.dtype
    ref_bf16 = reference_bf16_mxu(X, A, W, bias)
    assert jnp.allclose(out, ref_bf16, atol=1e-2, rtol=1e-2), "bf16-path mismatch"

    # Full-f32 path matches the original PyTorch (f32) forward tightly.
    out_f32 = graph_conv(X, A, W, bias, use_bf16_mxu=False)
    jax.block_until_ready(out_f32)
    ref = reference_f32(X, A, W, bias)
    assert jnp.allclose(out_f32, ref, atol=1e-4, rtol=1e-4), "f32-path mismatch"

    # Note: the PyTorch module defines LeakyReLU but never applies it in forward(),
    # so the kernel intentionally omits it.
    print("KERNEL_OK")
</pallas_src>

<mosaic_0001>
module attributes {stable_mosaic.version = 11 : i64} {
  func.func @_graphconv_kernel(%arg0: i32, %arg1: memref<16x16xbf16, #tpu.memory_space<vmem>>, %arg2: memref<2x8x8xbf16, #tpu.memory_space<vmem>>, %arg3: memref<16x128xbf16, #tpu.memory_space<vmem>>, %arg4: memref<8x128xf32, #tpu.memory_space<vmem>>, %arg5: memref<2x8x128xf32, #tpu.memory_space<vmem>>) attributes {dimension_semantics = [#tpu.dimension_semantics<parallel>], iteration_bounds = array<i64: 1>, scalar_prefetch = 0 : i64, scratch_operands = 0 : i64, tpu.core_type = #tpu.core_type<tc>, window_params = [{transform_indices = @transform_0, window_bounds = array<i64: 16, 16>}, {transform_indices = @transform_1, window_bounds = array<i64: 2, 8, 8>}, {pipeline_mode = #tpu.pipeline_mode<synchronous>, transform_indices = @transform_2, window_bounds = array<i64: 16, 128>}, {pipeline_mode = #tpu.pipeline_mode<synchronous>, transform_indices = @transform_3, window_bounds = array<i64: 8, 128>}, {transform_indices = @transform_4, window_bounds = array<i64: 2, 8, 128>}]} {
    %c0 = arith.constant 0 : index
    %c0_0 = arith.constant 0 : index
    %0 = vector.load %arg1[%c0, %c0_0] : memref<16x16xbf16, #tpu.memory_space<vmem>>, vector<16x16xbf16>
    %c0_1 = arith.constant 0 : index
    %c0_2 = arith.constant 0 : index
    %1 = vector.load %arg3[%c0_1, %c0_2] : memref<16x128xbf16, #tpu.memory_space<vmem>>, vector<16x128xbf16>
    %cst = arith.constant dense<0.000000e+00> : vector<16x128xf32>
    %2 = tpu.matmul %0, %1, %cst {dimension_numbers = #tpu.dot_dimension_numbers<[1], [0], [0], [1], [0, 0, 1, 1], [], []>} : vector<16x16xbf16>, vector<16x128xbf16>, vector<16x128xf32> -> vector<16x128xf32>
    %c0_3 = arith.constant 0 : index
    %c0_4 = arith.constant 0 : index
    %3 = vector.load %arg4[%c0_3, %c0_4] : memref<8x128xf32, #tpu.memory_space<vmem>>, vector<8x128xf32>
    %4 = vector.extract_strided_slice %2 {offsets = [0, 0], sizes = [8, 128], strides = [1, 1]} : vector<16x128xf32> to vector<8x128xf32>
    %5 = arith.truncf %4 : vector<8x128xf32> to vector<8x128xbf16>
    %c0_5 = arith.constant 0 : index
    %c0_6 = arith.constant 0 : index
    %c0_7 = arith.constant 0 : index
    %6 = vector.load %arg2[%c0_5, %c0_6, %c0_7] : memref<2x8x8xbf16, #tpu.memory_space<vmem>>, vector<1x8x8xbf16>
    %7 = vector.shape_cast %6 : vector<1x8x8xbf16> to vector<8x8xbf16>
    %cst_8 = arith.constant dense<0.000000e+00> : vector<8x128xf32>
    %8 = tpu.matmul %7, %5, %cst_8 {dimension_numbers = #tpu.dot_dimension_numbers<[1], [0], [0], [1], [0, 0, 1, 1], [], []>} : vector<8x8xbf16>, vector<8x128xbf16>, vector<8x128xf32> -> vector<8x128xf32>
    %9 = arith.addf %8, %3 : vector<8x128xf32>
    %c0_9 = arith.constant 0 : index
    %c0_10 = arith.constant 0 : index
    %c0_11 = arith.constant 0 : index
    %10 = vector.load %arg5[%c0_9, %c0_10, %c0_11] : memref<2x8x128xf32, #tpu.memory_space<vmem>>, vector<1x8x128xf32>
    %11 = vector.shape_cast %10 : vector<1x8x128xf32> to vector<8x128xf32>
    %12 = vector.shape_cast %9 : vector<8x128xf32> to vector<1x8x128xf32>
    tpu.vector_store %arg5[%c0_9, %c0_10, %c0_11], %12 {strides = array<i32>} : memref<2x8x128xf32, #tpu.memory_space<vmem>>, vector<1x8x128xf32>,
    %13 = vector.extract_strided_slice %2 {offsets = [8, 0], sizes = [8, 128], strides = [1, 1]} : vector<16x128xf32> to vector<8x128xf32>
    %14 = arith.truncf %13 : vector<8x128xf32> to vector<8x128xbf16>
    %c1 = arith.constant 1 : index
    %c0_12 = arith.constant 0 : index
    %c0_13 = arith.constant 0 : index
    %15 = vector.load %arg2[%c1, %c0_12, %c0_13] : memref<2x8x8xbf16, #tpu.memory_space<vmem>>, vector<1x8x8xbf16>
    %16 = vector.shape_cast %15 : vector<1x8x8xbf16> to vector<8x8xbf16>
    %cst_14 = arith.constant dense<0.000000e+00> : vector<8x128xf32>
    %17 = tpu.matmul %16, %14, %cst_14 {dimension_numbers = #tpu.dot_dimension_numbers<[1], [0], [0], [1], [0, 0, 1, 1], [], []>} : vector<8x8xbf16>, vector<8x128xbf16>, vector<8x128xf32> -> vector<8x128xf32>
    %18 = arith.addf %17, %3 : vector<8x128xf32>
    %c1_15 = arith.constant 1 : index
    %c0_16 = arith.constant 0 : index
    %c0_17 = arith.constant 0 : index
    %19 = vector.load %arg5[%c1_15, %c0_16, %c0_17] : memref<2x8x128xf32, #tpu.memory_space<vmem>>, vector<1x8x128xf32>
    %20 = vector.shape_cast %19 : vector<1x8x128xf32> to vector<8x128xf32>
    %21 = vector.shape_cast %18 : vector<8x128xf32> to vector<1x8x128xf32>
    tpu.vector_store %arg5[%c1_15, %c0_16, %c0_17], %21 {strides = array<i32>} : memref<2x8x128xf32, #tpu.memory_space<vmem>>, vector<1x8x128xf32>,
    return
  }
  func.func @transform_0(%arg0: i32) -> (i32, i32) {
    %c0_i32 = arith.constant 0 : i32
    %c0_i32_0 = arith.constant 0 : i32
    return %arg0, %c0_i32 : i32, i32
  }
  func.func @transform_1(%arg0: i32) -> (i32, i32, i32) {
    %c0_i32 = arith.constant 0 : i32
    %c0_i32_0 = arith.constant 0 : i32
    %c0_i32_1 = arith.constant 0 : i32
    return %arg0, %c0_i32, %c0_i32_0 : i32, i32, i32
  }
  func.func @transform_2(%arg0: i32) -> (i32, i32) {
    %c0_i32 = arith.constant 0 : i32
    %c0_i32_0 = arith.constant 0 : i32
    %c0_i32_1 = arith.constant 0 : i32
    return %c0_i32, %c0_i32_0 : i32, i32
  }
  func.func @transform_3(%arg0: i32) -> (i32, i32) {
    %c0_i32 = arith.constant 0 : i32
    %c0_i32_0 = arith.constant 0 : i32
    %c0_i32_1 = arith.constant 0 : i32
    return %c0_i32, %c0_i32_0 : i32, i32
  }
  func.func @transform_4(%arg0: i32) -> (i32, i32, i32) {
    %c0_i32 = arith.constant 0 : i32
    %c0_i32_0 = arith.constant 0 : i32
    %c0_i32_1 = arith.constant 0 : i32
    return %arg0, %c0_i32, %c0_i32_0 : i32, i32, i32
  }
}

</mosaic_0001>

<bundles_post_ra>
// kernel: tpu_custom_call.1
= control target key start
LH: loop header
LB: loop body
LE: loop exit
PB: predicated region body
PF: predicated region fallthrough
CT: control target
= control target key end

     0   :  { %9 = vsyncpa [#allocation3], 0  ;;  %s455_s0 = inlined_call_operand.hbm [shape: bf16[16,16], index: 0, kind: input, shape index: {}]   ;;  %s456_s1 = inlined_call_operand.hbm [shape: bf16[2,8,8], index: 1, kind: input, shape index: {}]   ;;  %s457_s2 = inlined_call_operand.hbm [shape: bf16[16,128], index: 2, kind: input, shape index: {}]   ;;  %s458_s3 = inlined_call_operand.hbm [shape: f32[8,128], index: 3, kind: input, shape index: {}]   ;;  %s459_s4 = inlined_call_operand.hbm [shape: f32[2,8,128], index: 4, kind: output, shape index: {}]  }
   0x1   :  { %10 = vsyncpa [#allocation6], 0 }
   0x2   :  { %11 = vsyncpa [#allocation9], 0 }
   0x3   :  { %12 = vsyncpa [#allocation4], 0  ;;  %s404_s15 = smov [#allocation5]   ;;  %s405_s17 = smov [#allocation2]  }
   0x4   :  { %s30_s16 = sshll.u32 %s404_s15, 4  ;;  %s18_s18 = sshll.u32 %s405_s17, 4  ;;  %s31_s16 = int_to_ptr.vmem [resolvable:$true] %s30_s16  ;;  %s19_s18 = int_to_ptr.vmem [resolvable:$true] %s18_s18 }
   0x5   :  { %s304_s19 = scalar_lea.vmem %s31_s16, 128  ;;  %p309_p1 = scmp.lt.s32.totalorder %s31_s16, %s31_s16 }
   0x6   :  { %p305_p0 = scmp.ne.s32.totalorder %s31_s16, %s304_s19  ;;  %p310_p2 = scmp.lt.s32.totalorder %s304_s19, %s304_s19 }
   0x8   :  { %p311_p3 = por %p310_p2, %p309_p1 }
   0xa   :  { %p312_p4 = pnand %p311_p3, %p305_p0 }
   0xc   :  { %315 = shalt.err (!%p312_p4)
}
   0xd   :  { %s406_s20 = smov 64   ;;  %s407_s21 = smov 4  }
   0xe   :  { %36 = dma.hbm_to_vmem [thread:$0]  %s456_s1, 128, %s31_s16, [#allocation6], %s406_s20, %s406_s20, %s407_s21  }
   0xf   :  { %s324_s24 = scalar_lea.vmem %s19_s18, 128  ;;  %p329_p6 = scmp.lt.s32.totalorder %s19_s18, %s19_s18 }
  0x10   :  { %p325_p5 = scmp.ne.s32.totalorder %s19_s18, %s324_s24  ;;  %p330_p7 = scmp.lt.s32.totalorder %s324_s24, %s324_s24 }
  0x12   :  { %p331_p8 = por %p330_p7, %p329_p6 }
  0x14   :  { %p332_p9 = pnand %p331_p8, %p325_p5 }
  0x16   :  { %335 = shalt.err (!%p332_p9)
}
  0x17   :  { %24 = dma.hbm_to_vmem [thread:$0]  %s455_s0, 128, %s19_s18, [#allocation3], %s406_s20, %s406_s20, %s407_s21  }
  0x18   :  { %s408_s27 = smov [#allocation7]   ;;  %s409_s29 = smov [#allocation8]  }
  0x19   :  { %s42_s28 = sshll.u32 %s408_s27, 4  ;;  %s55_s30 = sshll.u32 %s409_s29, 4  ;;  %s43_s28 = int_to_ptr.vmem [resolvable:$true] %s42_s28  ;;  %s56_s30 = int_to_ptr.vmem [resolvable:$true] %s55_s30 }
  0x1a   :  { %s344_s5 = scalar_lea.vmem %s43_s28, 128  ;;  %p349_p11 = scmp.lt.s32.totalorder %s43_s28, %s43_s28 }
  0x1b   :  { %p345_p10 = scmp.ne.s32.totalorder %s43_s28, %s344_s5  ;;  %p350_p12 = scmp.lt.s32.totalorder %s344_s5, %s344_s5 }
  0x1d   :  { %p351_p13 = por %p350_p12, %p349_p11 }
  0x1f   :  { %p352_p0 = pnand %p351_p13, %p345_p10 }
  0x21   :  { %355 = shalt.err (!%p352_p0)
}
  0x22   :  { %48 = dma.hbm_to_vmem [thread:$0]  %s457_s2, 128, %s43_s28, [#allocation6], %s406_s20, %s406_s20, %s407_s21  }
  0x23   :  { %s364_s7 = scalar_lea.vmem %s56_s30, 128  ;;  %p369_p2 = scmp.lt.s32.totalorder %s56_s30, %s56_s30 }
  0x24   :  { %p365_p1 = scmp.ne.s32.totalorder %s56_s30, %s364_s7  ;;  %p370_p3 = scmp.lt.s32.totalorder %s364_s7, %s364_s7 }
  0x26   :  { %p371_p4 = por %p370_p3, %p369_p2 }
  0x28   :  { %p372_p5 = pnand %p371_p4, %p365_p1 }
  0x2a   :  { %375 = shalt.err (!%p372_p5)
}
  0x2b   :  { %58 = dma.hbm_to_vmem [thread:$0]  %s458_s3, 128, %s56_s30, [#allocation9]  }
  0x2c   :  { %396 = dma.done.wait [#allocation3], 128  }
  0x2d   :  { %397 = vsyncadd [#allocation3], 4294967168 }
  0x2e   :  { %398 = dma.done.wait [#allocation6], 256  }
  0x2f   :  { %399 = vsyncadd [#allocation6], 4294967040 }
  0x30   :  { %400 = dma.done.wait [#allocation9], 128  }
  0x31   :  { %401 = vsyncadd [#allocation9], 4294967168  ;;  %v410_v0 = vmov 0.0   ;;  %vm411_vm0 = vmmov 0   ;;  %v294_v1 = vld [vmem:[#allocation7] sm:$0xff]   ;;  %v295_v2 = vld [vmem:[#allocation2] sm:$0xff]  }
  0x32   :  { %265 = vmatprep.subr.bf16.mxu0 %v410_v0  ;;  %267 = vmatprep.mubr.msk.bf16.mxu0 %vm411_vm0, %v410_v0  ;;  %vm87_vm1 = vcmask 130048   ;;  %vm139_vm2 = vcmask 1043456   ;;  %v134_v8 = vld [vmem:[#allocation5] sm:$0xf]  ;;  %vm135_vm3 = vcmask 64512   ;;  %v132_v13 = vld [vmem:[#allocation8] sm:$0xff] }
  0x33   :  { %271 = vmatprep.subr.bf16.mxu1 %v410_v0  ;;  %273 = vmatprep.mubr.msk.bf16.mxu1 %vm411_vm0, %v410_v0  ;;  %v186_v12 = vld [vmem:[#allocation5 + $0x4] sm:$0xf]  ;;  %s412_s2 = smov [#allocation10]  }
  0x34   :  { %266 = vmatpush3.bf16.msra.mxu0 %v294_v1  ;;  %s240_s3 = sshll.u32 %s412_s2, 4  ;;  %s241_s3 = int_to_ptr.vmem [resolvable:$true] %s240_s3 }
  0x35   :  { %277 = vmatprep.subr.bf16.mxu0 %v410_v0  ;;  %s376_s9 = scalar_lea.vmem %s241_s3, 256  ;;  %p381_p7 = scmp.lt.s32.totalorder %s241_s3, %s241_s3 }
  0x36   :  { %p377_p6 = scmp.ne.s32.totalorder %s241_s3, %s376_s9  ;;  %p382_p8 = scmp.lt.s32.totalorder %s376_s9, %s376_s9 }
  0x37   :  { %268 = vmatmul.mubr.msk.bf16.vlgmr.msra.gmra.mxu0 %vm87_vm1, %v295_v2 }
  0x38   :  { %279 = vmatprep.mubr.msk.bf16.mxu0 %vm411_vm0, %v410_v0  ;;  %p383_p9 = por %p382_p8, %p381_p7 }
  0x3a   :  { %p384_p10 = pnand %p383_p9, %p377_p6 }
  0xf7   :  { %v125_v3 = vpop.f32.mrf.mxu0 }
  0xf8   :  { %v133_v4 = vpack.c.bf16 %v125_v3, %v125_v3 }
  0xf9   :  { %v269_v5 = vpop.f32.mrf.mxu0 }
  0xfa   :  { %v141_v6 = vsel %vm139_vm2, %v133_v4, 0 }
  0xfb   :  { %v128_v7 = vpop.f32.mrf.mxu0  ;;  %272 = vmatpush3.bf16.msra.mxu1 %v141_v6 }
  0xfc   :  { %v184_v9 = vpack.c.bf16 %v128_v7, %v128_v7 }
  0xfd   :  { %v270_v10 = vpop.f32.mrf.mxu0 }
  0xfe   :  { %v191_v11 = vsel %vm139_vm2, %v184_v9, 0  ;;  %274 = vmatmul.mubr.msk.bf16.vlgmr.msra.gmra.mxu1 %vm135_vm3, %v134_v8 }
  0xff   :  { %278 = vmatpush3.bf16.msra.mxu0 %v191_v11 }
 0x102   :  { %280 = vmatmul.mubr.msk.bf16.vlgmr.msra.gmra.mxu0 %vm135_vm3, %v186_v12 }
 0x1be   :  { %v177_v14 = vpop.f32.mrf.mxu1 }
 0x1bf   :  { %v178_v15 = vadd.f32 %v177_v14, %v132_v13 }
 0x1c0   :  { %v275_v16 = vpop.f32.mrf.mxu1 }
 0x1c1   :  { %183 = vst [vmem:[#allocation10] sm:$0xff] %v178_v15 }
 0x1c2   :  { %v227_v17 = vpop.f32.mrf.mxu0  ;;  %v180_v18 = vpop.f32.mrf.mxu1 }
 0x1c3   :  { %v228_v19 = vadd.f32 %v227_v17, %v132_v13 }
 0x1c4   :  { %v281_v20 = vpop.f32.mrf.mxu0  ;;  %v276_v21 = vpop.f32.mrf.mxu1 }
 0x1c5   :  { %234 = vst [vmem:[#allocation10 + $0x8] sm:$0xff] %v228_v19 }
 0x1c6   :  { %v230_v22 = vpop.f32.mrf.mxu0 }
 0x1c7   :  { %387 = shalt.err (!%p384_p10)
}
 0x1c8   :  { %s413_s10 = smov 128   ;;  %s414_s11 = smov 8   ;;  %v282_v23 = vpop.f32.mrf.mxu0 }
 0x1c9   :  { %246 = dma.vmem_to_hbm [thread:$0]  %s241_s3, 256, %s459_s4, [#allocation4], %s413_s10, %s413_s10, %s414_s11  }
 0x1ca   :  { %402 = dma.done.wait [#allocation4], 256  }
 0x1cb   :  { %403 = vsyncadd [#allocation4], 4294967040 }
 0x1cc   :  { %250 = vsyncpa [#allocation3], 1 }
 0x1cd   :  { %251 = vsyncpa [#allocation6], 1 }
 0x1ce   :  { %252 = vsyncpa [#allocation9], 1 }
 0x1cf   :  { %253 = vsyncpa [#allocation4], 1 }

</bundles_post_ra>
